<compile_context>
chip_gen: v5e
topology: v5e:2x2
jax: 0.10.0
libtpu: 0.0.40
codegen_flags: <defaults>
</compile_context>

<pallas_src>
import functools

import jax
import jax.numpy as jnp
from jax.experimental import pallas as pl
from jax.experimental.pallas import tpu as pltpu

IMAGE_SIZE = 784
H0, H1, H2 = 100, 50, 10          # true layer widths
PAD = 128                         # lane-padded width used inside the kernel
DROP_P = 0.4
KEEP_P = 1.0 - DROP_P

# keep iff uniform-int32 hash < _KEEP_THRESH  (= round(0.6 * 2^32) - 2^31)
_KEEP_THRESH = 429496730

# odd 32-bit mixing constants, written as signed int32 values
_K_ROW = -1640531535     # 0x9E3779B1
_K_COL = 668265263       # 0x27D4EB2F
_K_SEED = -2049050413    # 0x85EBCA6B
_K_MIX1 = -1028477387    # 0xC2B2AE35
_K_MIX2 = -862048943     # 0xCC9E2D51
_K_SALT_U = 0x7FEB352D   # large odd constant; pre-multiplied into per-layer salts


def _i32(x):
    """Wrap a Python int to signed int32 (two's complement)."""
    x &= 0xFFFFFFFF
    return x - (1 << 32) if x >= (1 << 31) else x


# Per-layer salt offsets: salt * large-odd-constant, wrapped to int32, so the
# three layer masks start far apart BEFORE mixing (lets us use only 2 rounds).
_SALT1 = _i32(1 * _K_SALT_U)
_SALT2 = _i32(2 * _K_SALT_U)
_SALT3 = _i32(3 * _K_SALT_U)


def _keep_mask(base, salt_c):
    """Counter-based dropout keep-mask, P(keep)=0.6.

    `base` is the shared per-element counter (row/col/seed already mixed in,
    computed once per tile); `salt_c` is the per-layer wrapped odd-constant
    offset.  Two xorshift-multiply rounds: the final multiply pushes all input
    entropy into the high bits, which are what the signed threshold compare
    uses.  Pure int32 VPU ops -> lowers on Mosaic and the interpreter alike.
    """
    h = base + jnp.int32(salt_c)
    h = h ^ (h << 13)
    h = h * jnp.int32(_K_MIX1)
    h = h ^ (h << 17)
    h = h * jnp.int32(_K_MIX2)
    return h < jnp.int32(_KEEP_THRESH)


def mlp_kernel(tb, seed_ref, x_ref, w0_ref, w1_ref, w2_ref, b_ref, out_ref):
    seed = seed_ref[0]                                 # int32 scalar (SMEM)
    row_off = pl.program_id(0) * tb                    # global row offset of this tile

    x = x_ref[...]                                     # (TB, 784) bf16
    b_all = b_ref[...]                                 # (8, 128) f32: rows 0..2 = b0,b1,b2

    # Shared dropout counter base, computed ONCE per tile (keyed by GLOBAL row
    # index -> masks are invariant to the batch tiling).
    shape = (tb, PAD)
    r = jax.lax.broadcasted_iota(jnp.int32, shape, 0) + row_off
    c = jax.lax.broadcasted_iota(jnp.int32, shape, 1)
    base = (r * jnp.int32(_K_ROW) + c * jnp.int32(_K_COL)
            + seed * jnp.int32(_K_SEED))

    # fc0 + ReLU + dropout (1/keep rescale folded into w1)
    h = jnp.dot(x, w0_ref[...], preferred_element_type=jnp.float32) + b_all[0:1, :]
    h = jnp.maximum(h, 0.0)
    h = jnp.where(_keep_mask(base, _SALT1), h, 0.0)

    # fc1 (pre-scaled by 1/keep) + ReLU + dropout (1/keep rescale folded into w2)
    h = jnp.dot(h.astype(jnp.bfloat16), w1_ref[...],
                preferred_element_type=jnp.float32) + b_all[1:2, :]
    h = jnp.maximum(h, 0.0)
    h = jnp.where(_keep_mask(base, _SALT2), h, 0.0)

    # fc2 (pre-scaled by 1/keep) + ReLU + dropout (rescale must stay in-kernel)
    h = jnp.dot(h.astype(jnp.bfloat16), w2_ref[...],
                preferred_element_type=jnp.float32) + b_all[2:3, :]
    h = jnp.maximum(h, 0.0)
    h = jnp.where(_keep_mask(base, _SALT3), h * jnp.float32(1.0 / KEEP_P), 0.0)

    # log_softmax over the 10 real classes (padded lanes masked to -1e30).
    # NOTE: ReLU+dropout on the logits before log_softmax matches the reference
    # module exactly (it really does relu/drop on fc2's output).
    logits = jnp.where(c < H2, h, -1e30)
    m = jnp.max(logits, axis=-1, keepdims=True)
    lse = jnp.log(jnp.sum(jnp.exp(logits - m), axis=-1, keepdims=True)) + m
    out_ref[...] = logits - lse                        # (TB, 128), lane-dense f32


def init_params(key):
    """Deterministic Linear-style init: uniform(-1/sqrt(fan_in), 1/sqrt(fan_in))."""
    ks = jax.random.split(key, 6)

    def lin(kw, kb, fan_in, fan_out):
        bound = 1.0 / jnp.sqrt(fan_in)
        w = jax.random.uniform(kw, (fan_in, fan_out), jnp.float32, -bound, bound)
        b = jax.random.uniform(kb, (fan_out,), jnp.float32, -bound, bound)
        return w, b

    w0, b0 = lin(ks[0], ks[1], IMAGE_SIZE, H0)
    w1, b1 = lin(ks[2], ks[3], H0, H1)
    w2, b2 = lin(ks[4], ks[5], H1, H2)
    return (w0, b0, w1, b1, w2, b2)


def prepare_params(params):
    """One-time param prep (hoisted out of the per-forward path):
    zero-pad feature dims to 128 lanes, fold the 1/keep rescale of the first
    two dropouts into w1/w2, cast the weight slabs to bfloat16 (MXU operands),
    and pack the three biases into a single (8,128) f32 slab.
    """
    w0, b0, w1, b1, w2, b2 = params
    inv_keep = jnp.float32(1.0 / KEEP_P)
    w0p = jnp.zeros((IMAGE_SIZE, PAD), jnp.float32).at[:, :H0].set(w0)
    w1p = jnp.zeros((PAD, PAD), jnp.float32).at[:H0, :H1].set(w1 * inv_keep)
    w2p = jnp.zeros((PAD, PAD), jnp.float32).at[:H1, :H2].set(w2 * inv_keep)
    bpack = (jnp.zeros((8, PAD), jnp.float32)
             .at[0, :H0].set(b0)
             .at[1, :H1].set(b1)
             .at[2, :H2].set(b2))
    return (w0p.astype(jnp.bfloat16),
            w1p.astype(jnp.bfloat16),
            w2p.astype(jnp.bfloat16),
            bpack)


def _round_up(n, m):
    return (n + m - 1) // m * m


def _tb_max_for_device():
    """Max batch-tile rows: 1024 on v5e/v6e (already at HBM roofline plateau),
    2048 on v7x/newer (amortize per-grid-step overhead vs 3.2 TB/s HBM)."""
    try:
        kind = jax.devices()[0].device_kind.lower()
    except Exception:
        kind = ""
    if "v5" in kind or "v6" in kind:
        return 1024
    return 2048


def _choose_tiling(B):
    """Balanced tiles: n_tiles = cdiv(B, TB_max); at least 2 tiles once B is
    big enough to matter so the 'parallel' batch axis can use both v7x TCs."""
    tb_max = _tb_max_for_device()
    n_tiles = max(pl.cdiv(B, tb_max), 2 if B >= 128 else 1)
    tb = _round_up(pl.cdiv(B, n_tiles), 16)   # 16: bf16 sublane packing
    return tb, n_tiles


def neural_net_c_forward(x, prepared_params, seed):
    """x: any shape with trailing elements a multiple of 784 (e.g. (B,1,28,28)).
    Returns (B, 10) float32 log-probabilities (training-mode dropout, like the
    reference module).
    """
    w0p, w1p, w2p, bpack = prepared_params
    x2 = x.reshape(-1, IMAGE_SIZE).astype(jnp.bfloat16)      # x.view(-1, 784), bf16 stream
    B = x2.shape[0]

    tb, n_tiles = _choose_tiling(B)
    b_pad = tb * n_tiles
    if b_pad != B:
        x2 = jnp.pad(x2, ((0, b_pad - B), (0, 0)))

    seed_arr = jnp.asarray(seed, dtype=jnp.int32).reshape((1,))
    kernel = functools.partial(mlp_kernel, tb)

    out_padded = pl.pallas_call(
        kernel,
        out_shape=jax.ShapeDtypeStruct((b_pad, PAD), jnp.float32),
        grid=(n_tiles,),
        in_specs=[
            pl.BlockSpec(memory_space=pltpu.MemorySpace.SMEM),      # seed (scalar)
            pl.BlockSpec((tb, IMAGE_SIZE), lambda i: (i, 0)),       # x: streamed per tile (bf16)
            pl.BlockSpec((IMAGE_SIZE, PAD), lambda i: (0, 0)),      # w0: VMEM-resident (bf16)
            pl.BlockSpec((PAD, PAD), lambda i: (0, 0)),             # w1: VMEM-resident (bf16)
            pl.BlockSpec((PAD, PAD), lambda i: (0, 0)),             # w2: VMEM-resident (bf16)
            pl.BlockSpec((8, PAD), lambda i: (0, 0)),               # packed biases (f32)
        ],
        out_specs=pl.BlockSpec((tb, PAD), lambda i: (i, 0)),        # lane-dense output
        compiler_params=pltpu.CompilerParams(
            dimension_semantics=("parallel",),          # shard batch tiles across TCs (v7x)
            vmem_limit_bytes=48 * 1024 * 1024,          # explicit: headroom under 64 MiB v7x
        ),
    )(seed_arr, x2, w0p, w1p, w2p, bpack)

    return out_padded[:B, :H2]                                      # (B, 10) log-probs


if __name__ == "__main__":
    key = jax.random.PRNGKey(0)
    k_param, k_x = jax.random.split(key)

    params = init_params(k_param)
    prepared = prepare_params(params)

    # MNIST-like input: batch=8, (B, 1, 28, 28); stored as bf16 so the kernel
    # streams bf16 directly (no extra f32->bf16 pass on the hot path).
    x = jax.random.normal(k_x, (8, 1, 28, 28), dtype=jnp.bfloat16)

    out = neural_net_c_forward(x, prepared, seed=1234)
    out = jax.block_until_ready(out)

    assert out.shape == (8, 10), out.shape
    # log_softmax rows must sum to 1 in probability space
    row_sums = jnp.sum(jnp.exp(out), axis=-1)
    assert jnp.allclose(row_sums, 1.0, atol=1e-4), row_sums

    print("KERNEL_OK")
</pallas_src>

<mosaic_0001>
module attributes {stable_mosaic.version = 11 : i64} {
  func.func @mlp_kernel(%arg0: i32, %arg1: memref<1xi32, #tpu.memory_space<smem>>, %arg2: memref<16x784xbf16, #tpu.memory_space<vmem>>, %arg3: memref<784x128xbf16, #tpu.memory_space<vmem>>, %arg4: memref<128x128xbf16, #tpu.memory_space<vmem>>, %arg5: memref<128x128xbf16, #tpu.memory_space<vmem>>, %arg6: memref<8x128xf32, #tpu.memory_space<vmem>>, %arg7: memref<16x128xf32, #tpu.memory_space<vmem>>) attributes {dimension_semantics = [#tpu.dimension_semantics<parallel>], iteration_bounds = array<i64: 1>, scalar_prefetch = 0 : i64, scratch_operands = 0 : i64, tpu.core_type = #tpu.core_type<tc>, window_params = [{transform_indices = @transform_0, window_bounds = array<i64: 1>}, {transform_indices = @transform_1, window_bounds = array<i64: 16, 784>}, {pipeline_mode = #tpu.pipeline_mode<synchronous>, transform_indices = @transform_2, window_bounds = array<i64: 784, 128>}, {pipeline_mode = #tpu.pipeline_mode<synchronous>, transform_indices = @transform_3, window_bounds = array<i64: 128, 128>}, {pipeline_mode = #tpu.pipeline_mode<synchronous>, transform_indices = @transform_4, window_bounds = array<i64: 128, 128>}, {pipeline_mode = #tpu.pipeline_mode<synchronous>, transform_indices = @transform_5, window_bounds = array<i64: 8, 128>}, {transform_indices = @transform_6, window_bounds = array<i64: 16, 128>}]} {
    %c0 = arith.constant 0 : index
    %0 = memref.load %arg1[%c0] : memref<1xi32, #tpu.memory_space<smem>>
    %c16_i32 = arith.constant 16 : i32
    %1 = arith.muli %arg0, %c16_i32 : i32
    %c0_0 = arith.constant 0 : index
    %c0_1 = arith.constant 0 : index
    %2 = vector.load %arg2[%c0_0, %c0_1] : memref<16x784xbf16, #tpu.memory_space<vmem>>, vector<16x784xbf16>
    %c0_2 = arith.constant 0 : index
    %c0_3 = arith.constant 0 : index
    %3 = vector.load %arg6[%c0_2, %c0_3] : memref<8x128xf32, #tpu.memory_space<vmem>>, vector<8x128xf32>
    %4 = tpu.iota {dimensions = array<i32: 0>} : vector<16x128xi32>
    %5 = vector.broadcast %1 : i32 to vector<16x128xi32>
    %6 = arith.addi %4, %5 : vector<16x128xi32>
    %7 = tpu.iota {dimensions = array<i32: 1>} : vector<16x128xi32>
    %c-1640531535_i32 = arith.constant -1640531535 : i32
    %8 = vector.broadcast %c-1640531535_i32 : i32 to vector<16x128xi32>
    %9 = arith.muli %6, %8 : vector<16x128xi32>
    %c668265263_i32 = arith.constant 668265263 : i32
    %10 = vector.broadcast %c668265263_i32 : i32 to vector<16x128xi32>
    %11 = arith.muli %7, %10 : vector<16x128xi32>
    %12 = arith.addi %9, %11 : vector<16x128xi32>
    %c-2049050413_i32 = arith.constant -2049050413 : i32
    %13 = arith.muli %0, %c-2049050413_i32 : i32
    %14 = vector.broadcast %13 : i32 to vector<16x128xi32>
    %15 = arith.addi %12, %14 : vector<16x128xi32>
    %c0_4 = arith.constant 0 : index
    %c0_5 = arith.constant 0 : index
    %16 = vector.load %arg3[%c0_4, %c0_5] : memref<784x128xbf16, #tpu.memory_space<vmem>>, vector<784x128xbf16>
    %cst = arith.constant dense<0.000000e+00> : vector<16x128xf32>
    %17 = tpu.matmul %2, %16, %cst {dimension_numbers = #tpu.dot_dimension_numbers<[1], [0], [0], [1], [0, 0, 1, 1], [], []>} : vector<16x784xbf16>, vector<784x128xbf16>, vector<16x128xf32> -> vector<16x128xf32>
    %18 = vector.extract_strided_slice %3 {offsets = [0, 0], sizes = [1, 128], strides = [1, 1]} : vector<8x128xf32> to vector<1x128xf32>
    %19 = vector.broadcast %18 : vector<1x128xf32> to vector<16x128xf32>
    %20 = arith.addf %17, %19 : vector<16x128xf32>
    %cst_6 = arith.constant 0.000000e+00 : f32
    %21 = vector.broadcast %cst_6 : f32 to vector<16x128xf32>
    %22 = arith.maximumf %20, %21 : vector<16x128xf32>
    %c2146121005_i32 = arith.constant 2146121005 : i32
    %23 = vector.broadcast %c2146121005_i32 : i32 to vector<16x128xi32>
    %24 = arith.addi %15, %23 : vector<16x128xi32>
    %c13_i32 = arith.constant 13 : i32
    %25 = vector.broadcast %c13_i32 : i32 to vector<16x128xi32>
    %26 = arith.shli %24, %25 : vector<16x128xi32>
    %27 = arith.xori %24, %26 : vector<16x128xi32>
    %c-1028477387_i32 = arith.constant -1028477387 : i32
    %28 = vector.broadcast %c-1028477387_i32 : i32 to vector<16x128xi32>
    %29 = arith.muli %27, %28 : vector<16x128xi32>
    %c17_i32 = arith.constant 17 : i32
    %30 = vector.broadcast %c17_i32 : i32 to vector<16x128xi32>
    %31 = arith.shli %29, %30 : vector<16x128xi32>
    %32 = arith.xori %29, %31 : vector<16x128xi32>
    %c-862048943_i32 = arith.constant -862048943 : i32
    %33 = vector.broadcast %c-862048943_i32 : i32 to vector<16x128xi32>
    %34 = arith.muli %32, %33 : vector<16x128xi32>
    %c429496730_i32 = arith.constant 429496730 : i32
    %35 = vector.broadcast %c429496730_i32 : i32 to vector<16x128xi32>
    %36 = arith.cmpi slt, %34, %35 : vector<16x128xi32>
    %cst_7 = arith.constant 0.000000e+00 : f32
    %37 = vector.broadcast %cst_7 : f32 to vector<16x128xf32>
    %38 = arith.select %36, %22, %37 : vector<16x128xi1>, vector<16x128xf32>
    %39 = arith.truncf %38 : vector<16x128xf32> to vector<16x128xbf16>
    %c0_8 = arith.constant 0 : index
    %c0_9 = arith.constant 0 : index
    %40 = vector.load %arg4[%c0_8, %c0_9] : memref<128x128xbf16, #tpu.memory_space<vmem>>, vector<128x128xbf16>
    %cst_10 = arith.constant dense<0.000000e+00> : vector<16x128xf32>
    %41 = tpu.matmul %39, %40, %cst_10 {dimension_numbers = #tpu.dot_dimension_numbers<[1], [0], [0], [1], [0, 0, 1, 1], [], []>} : vector<16x128xbf16>, vector<128x128xbf16>, vector<16x128xf32> -> vector<16x128xf32>
    %42 = vector.extract_strided_slice %3 {offsets = [1, 0], sizes = [1, 128], strides = [1, 1]} : vector<8x128xf32> to vector<1x128xf32>
    %43 = vector.broadcast %42 : vector<1x128xf32> to vector<16x128xf32>
    %44 = arith.addf %41, %43 : vector<16x128xf32>
    %cst_11 = arith.constant 0.000000e+00 : f32
    %45 = vector.broadcast %cst_11 : f32 to vector<16x128xf32>
    %46 = arith.maximumf %44, %45 : vector<16x128xf32>
    %c-2725286_i32 = arith.constant -2725286 : i32
    %47 = vector.broadcast %c-2725286_i32 : i32 to vector<16x128xi32>
    %48 = arith.addi %15, %47 : vector<16x128xi32>
    %c13_i32_12 = arith.constant 13 : i32
    %49 = vector.broadcast %c13_i32_12 : i32 to vector<16x128xi32>
    %50 = arith.shli %48, %49 : vector<16x128xi32>
    %51 = arith.xori %48, %50 : vector<16x128xi32>
    %c-1028477387_i32_13 = arith.constant -1028477387 : i32
    %52 = vector.broadcast %c-1028477387_i32_13 : i32 to vector<16x128xi32>
    %53 = arith.muli %51, %52 : vector<16x128xi32>
    %c17_i32_14 = arith.constant 17 : i32
    %54 = vector.broadcast %c17_i32_14 : i32 to vector<16x128xi32>
    %55 = arith.shli %53, %54 : vector<16x128xi32>
    %56 = arith.xori %53, %55 : vector<16x128xi32>
    %c-862048943_i32_15 = arith.constant -862048943 : i32
    %57 = vector.broadcast %c-862048943_i32_15 : i32 to vector<16x128xi32>
    %58 = arith.muli %56, %57 : vector<16x128xi32>
    %c429496730_i32_16 = arith.constant 429496730 : i32
    %59 = vector.broadcast %c429496730_i32_16 : i32 to vector<16x128xi32>
    %60 = arith.cmpi slt, %58, %59 : vector<16x128xi32>
    %cst_17 = arith.constant 0.000000e+00 : f32
    %61 = vector.broadcast %cst_17 : f32 to vector<16x128xf32>
    %62 = arith.select %60, %46, %61 : vector<16x128xi1>, vector<16x128xf32>
    %63 = arith.truncf %62 : vector<16x128xf32> to vector<16x128xbf16>
    %c0_18 = arith.constant 0 : index
    %c0_19 = arith.constant 0 : index
    %64 = vector.load %arg5[%c0_18, %c0_19] : memref<128x128xbf16, #tpu.memory_space<vmem>>, vector<128x128xbf16>
    %cst_20 = arith.constant dense<0.000000e+00> : vector<16x128xf32>
    %65 = tpu.matmul %63, %64, %cst_20 {dimension_numbers = #tpu.dot_dimension_numbers<[1], [0], [0], [1], [0, 0, 1, 1], [], []>} : vector<16x128xbf16>, vector<128x128xbf16>, vector<16x128xf32> -> vector<16x128xf32>
    %66 = vector.extract_strided_slice %3 {offsets = [2, 0], sizes = [1, 128], strides = [1, 1]} : vector<8x128xf32> to vector<1x128xf32>
    %67 = vector.broadcast %66 : vector<1x128xf32> to vector<16x128xf32>
    %68 = arith.addf %65, %67 : vector<16x128xf32>
    %cst_21 = arith.constant 0.000000e+00 : f32
    %69 = vector.broadcast %cst_21 : f32 to vector<16x128xf32>
    %70 = arith.maximumf %68, %69 : vector<16x128xf32>
    %c2143395719_i32 = arith.constant 2143395719 : i32
    %71 = vector.broadcast %c2143395719_i32 : i32 to vector<16x128xi32>
    %72 = arith.addi %15, %71 : vector<16x128xi32>
    %c13_i32_22 = arith.constant 13 : i32
    %73 = vector.broadcast %c13_i32_22 : i32 to vector<16x128xi32>
    %74 = arith.shli %72, %73 : vector<16x128xi32>
    %75 = arith.xori %72, %74 : vector<16x128xi32>
    %c-1028477387_i32_23 = arith.constant -1028477387 : i32
    %76 = vector.broadcast %c-1028477387_i32_23 : i32 to vector<16x128xi32>
    %77 = arith.muli %75, %76 : vector<16x128xi32>
    %c17_i32_24 = arith.constant 17 : i32
    %78 = vector.broadcast %c17_i32_24 : i32 to vector<16x128xi32>
    %79 = arith.shli %77, %78 : vector<16x128xi32>
    %80 = arith.xori %77, %79 : vector<16x128xi32>
    %c-862048943_i32_25 = arith.constant -862048943 : i32
    %81 = vector.broadcast %c-862048943_i32_25 : i32 to vector<16x128xi32>
    %82 = arith.muli %80, %81 : vector<16x128xi32>
    %c429496730_i32_26 = arith.constant 429496730 : i32
    %83 = vector.broadcast %c429496730_i32_26 : i32 to vector<16x128xi32>
    %84 = arith.cmpi slt, %82, %83 : vector<16x128xi32>
    %cst_27 = arith.constant 1.66666663 : f32
    %85 = vector.broadcast %cst_27 : f32 to vector<16x128xf32>
    %86 = arith.mulf %70, %85 : vector<16x128xf32>
    %cst_28 = arith.constant 0.000000e+00 : f32
    %87 = vector.broadcast %cst_28 : f32 to vector<16x128xf32>
    %88 = arith.select %84, %86, %87 : vector<16x128xi1>, vector<16x128xf32>
    %c10_i32 = arith.constant 10 : i32
    %89 = vector.broadcast %c10_i32 : i32 to vector<16x128xi32>
    %90 = arith.cmpi slt, %7, %89 : vector<16x128xi32>
    %cst_29 = arith.constant -1.000000e+30 : f32
    %91 = vector.broadcast %cst_29 : f32 to vector<16x128xf32>
    %92 = arith.select %90, %88, %91 : vector<16x128xi1>, vector<16x128xf32>
    %cst_30 = arith.constant dense<0xFF800000> : vector<16xf32>
    %93 = vector.multi_reduction <maximumf>, %92, %cst_30 [1] : vector<16x128xf32> to vector<16xf32>
    %94 = vector.shape_cast %93 : vector<16xf32> to vector<16x1xf32>
    %95 = vector.broadcast %94 : vector<16x1xf32> to vector<16x128xf32>
    %96 = arith.subf %92, %95 : vector<16x128xf32>
    %97 = math.exp %96 : vector<16x128xf32>
    %cst_31 = arith.constant dense<0.000000e+00> : vector<16xf32>
    %98 = vector.multi_reduction <add>, %97, %cst_31 [1] : vector<16x128xf32> to vector<16xf32>
    %99 = vector.shape_cast %98 : vector<16xf32> to vector<16x1xf32>
    %100 = math.log %99 : vector<16x1xf32>
    %101 = arith.addf %100, %94 : vector<16x1xf32>
    %102 = vector.broadcast %101 : vector<16x1xf32> to vector<16x128xf32>
    %103 = arith.subf %92, %102 : vector<16x128xf32>
    %c0_32 = arith.constant 0 : index
    %c0_33 = arith.constant 0 : index
    %104 = vector.load %arg7[%c0_32, %c0_33] : memref<16x128xf32, #tpu.memory_space<vmem>>, vector<16x128xf32>
    tpu.vector_store %arg7[%c0_32, %c0_33], %103 {strides = array<i32>} : memref<16x128xf32, #tpu.memory_space<vmem>>, vector<16x128xf32>,
    return
  }
  func.func @transform_0(%arg0: i32) -> i32 {
    %c0_i32 = arith.constant 0 : i32
    %c0_i32_0 = arith.constant 0 : i32
    return %c0_i32 : i32
  }
  func.func @transform_1(%arg0: i32) -> (i32, i32) {
    %c0_i32 = arith.constant 0 : i32
    %c0_i32_0 = arith.constant 0 : i32
    return %arg0, %c0_i32 : i32, i32
  }
  func.func @transform_2(%arg0: i32) -> (i32, i32) {
    %c0_i32 = arith.constant 0 : i32
    %c0_i32_0 = arith.constant 0 : i32
    %c0_i32_1 = arith.constant 0 : i32
    return %c0_i32, %c0_i32_0 : i32, i32
  }
  func.func @transform_3(%arg0: i32) -> (i32, i32) {
    %c0_i32 = arith.constant 0 : i32
    %c0_i32_0 = arith.constant 0 : i32
    %c0_i32_1 = arith.constant 0 : i32
    return %c0_i32, %c0_i32_0 : i32, i32
  }
  func.func @transform_4(%arg0: i32) -> (i32, i32) {
    %c0_i32 = arith.constant 0 : i32
    %c0_i32_0 = arith.constant 0 : i32
    %c0_i32_1 = arith.constant 0 : i32
    return %c0_i32, %c0_i32_0 : i32, i32
  }
  func.func @transform_5(%arg0: i32) -> (i32, i32) {
    %c0_i32 = arith.constant 0 : i32
    %c0_i32_0 = arith.constant 0 : i32
    %c0_i32_1 = arith.constant 0 : i32
    return %c0_i32, %c0_i32_0 : i32, i32
  }
  func.func @transform_6(%arg0: i32) -> (i32, i32) {
    %c0_i32 = arith.constant 0 : i32
    %c0_i32_0 = arith.constant 0 : i32
    return %arg0, %c0_i32 : i32, i32
  }
}

</mosaic_0001>

<bundles_post_ra>
// kernel: tpu_custom_call.1
= control target key start
LH: loop header
LB: loop body
LE: loop exit
PB: predicated region body
PF: predicated region fallthrough
CT: control target
= control target key end

     0   :  { %12 = vsyncpa [#allocation4], 0  ;;  %s1556_s0 = inlined_call_operand.<no memory space> [shape: s32[1], index: 0, kind: input, shape index: {}]   ;;  %s1557_s1 = inlined_call_operand.hbm [shape: bf16[16,784], index: 1, kind: input, shape index: {}]   ;;  %s1558_s2 = inlined_call_operand.hbm [shape: bf16[784,128], index: 2, kind: input, shape index: {}]   ;;  %s1559_s3 = inlined_call_operand.hbm [shape: bf16[128,128], index: 3, kind: input, shape index: {}]   ;;  %s1560_s4 = inlined_call_operand.hbm [shape: bf16[128,128], index: 4, kind: input, shape index: {}]   ;;  %s1561_s5 = inlined_call_operand.hbm [shape: f32[8,128], index: 5, kind: input, shape index: {}]   ;;  %s1562_s6 = inlined_call_operand.hbm [shape: f32[16,128], index: 6, kind: output, shape index: {}]  }
   0x1   :  { %13 = vsyncpa [#allocation7], 0 }
   0x2   :  { %14 = vsyncpa [#allocation10], 0  ;;  %s35_s23 = sshll.u32 %s1558_s2, 4  ;;  %s36_s23 = int_to_ptr.hbm [resolvable:$true] %s35_s23 }
   0x3   :  { %15 = vsyncpa [#allocation5], 0  ;;  %s1469_s24 = smov [#allocation6]   ;;  %s61_s28 = sshll.u32 %s1560_s4, 4  ;;  %s62_s28 = int_to_ptr.hbm [resolvable:$true] %s61_s28 }
   0x4   :  { %s37_s25 = sshll.u32 %s1469_s24, 4  ;;  %s1470_s29 = smov 64   ;;  %s38_s25 = int_to_ptr.vmem [resolvable:$true] %s37_s25 }
   0x5   :  { %s1471_s30 = smov 4   ;;  %s1472_s7 = smov [#allocation9]  }
   0x6   :  { %43 = dma.hbm_to_vmem [thread:$0]  %s36_s23, 6272, %s38_s25, [#allocation7], %s1470_s29, %s1470_s29, %s1471_s30  }
   0x7   :  { %s63_s8 = sshll.u32 %s1472_s7, 4  ;;  %s22_s11 = sshll.u32 %s1557_s1, 4  ;;  %s64_s8 = int_to_ptr.vmem [resolvable:$true] %s63_s8  ;;  %s23_s11 = int_to_ptr.hbm [resolvable:$true] %s22_s11 }
   0x8   :  { %69 = dma.hbm_to_vmem [thread:$0]  %s62_s28, 1024, %s64_s8, [#allocation10], %s1470_s29, %s1470_s29, %s1471_s30  }
   0x9   :  { %s1473_s2 = smov [#allocation3]   ;;  %s48_s4 = sshll.u32 %s1559_s3, 4  ;;  %s49_s4 = int_to_ptr.hbm [resolvable:$true] %s48_s4 }
   0xa   :  { %s24_s12 = sshll.u32 %s1473_s2, 4  ;;  %s1474_s15 = smov 448   ;;  %s25_s12 = int_to_ptr.vmem [resolvable:$true] %s24_s12 }
   0xb   :  { %s1475_s16 = smov 28   ;;  %s1476_s17 = smov [#allocation8]  }
   0xc   :  { %30 = dma.hbm_to_vmem [thread:$0]  %s23_s11, 896, %s25_s12, [#allocation4], %s1474_s15, %s1474_s15, %s1475_s16  }
   0xd   :  { %s50_s18 = sshll.u32 %s1476_s17, 4  ;;  %s75_s1 = sshll.u32 %s1561_s5, 4  ;;  %s51_s18 = int_to_ptr.vmem [resolvable:$true] %s50_s18  ;;  %s76_s1 = int_to_ptr.hbm [resolvable:$true] %s75_s1 }
   0xe   :  { %56 = dma.hbm_to_vmem [thread:$0]  %s49_s4, 1024, %s51_s18, [#allocation7], %s1470_s29, %s1470_s29, %s1471_s30  }
   0xf   :  { %s1477_s21 = smov [#allocation11]  }
  0x10   :  { %s77_s22 = sshll.u32 %s1477_s21, 4  ;;  %s78_s22 = int_to_ptr.vmem [resolvable:$true] %s77_s22 }
  0x11   :  { %80 = dma.hbm_to_vmem [thread:$0]  %s76_s1, 128, %s78_s22, [#allocation10]  }
  0x12   :  { %1461 = dma.done.wait [#allocation4], 896  }
  0x13   :  { %1462 = vsyncadd [#allocation4], 4294966400 }
  0x14   :  { %1463 = dma.done.wait [#allocation7], 7296  }
  0x15   :  { %1464 = vsyncadd [#allocation7], 4294960000 }
  0x16   :  { %1465 = dma.done.wait [#allocation10], 1152  }
  0x17   :  { %1466 = vsyncadd [#allocation10], 4294966144  ;;  %v1239_v0 = vld [vmem:[#allocation6 + $0x38] sm:$0xff]  ;;  %v1238_v4 = vld [vmem:[#allocation6 + $0x30] sm:$0xff]  ;;  %vm558_vm0 = vcmask 130048   ;;  %s915_s27 = sshll.u32 %s1562_s6, 4  ;;  %s916_s27 = int_to_ptr.hbm [resolvable:$true] %s915_s27 }
  0x18   :  { %v1247_v1 = vld [vmem:[#allocation6 + $0x78] sm:$0xff]  ;;  %562 = vmatpush.bf16.msra.mxu0 %v1239_v0  ;;  %v1246_v5 = vld [vmem:[#allocation6 + $0x70] sm:$0xff]  ;;  %v1237_v8 = vld [vmem:[#allocation6 + $0x28] sm:$0xff]  ;;  %s126_s23 = smul.u32 2245916883, %s1556_s0  ;;  %s1478_s0 = smov [#allocation12]  }
  0x19   :  { %v1255_v2 = vld [vmem:[#allocation6 + $0xb8] sm:$0xff]  ;;  %576 = vmatpush.bf16.msra.mxu1 %v1247_v1  ;;  %v1254_v6 = vld [vmem:[#allocation6 + $0xb0] sm:$0xff]  ;;  %v1245_v9 = vld [vmem:[#allocation6 + $0x68] sm:$0xff]  ;;  %s913_s24 = sshll.u32 %s1478_s0, 4  ;;  %s1479_s28 = smov 128   ;;  %s914_s24 = int_to_ptr.vmem [resolvable:$true] %s913_s24 }
  0x1a   :  { %v1263_v3 = vld [vmem:[#allocation6 + $0xf8] sm:$0xff]  ;;  %590 = vmatpush.bf16.msra.mxu2 %v1255_v2  ;;  %v1262_v7 = vld [vmem:[#allocation6 + $0xf0] sm:$0xff]  ;;  %v1253_v10 = vld [vmem:[#allocation6 + $0xa8] sm:$0xff]  ;;  %s1480_s29 = smov 8  }
  0x1b   :  { %604 = vmatpush.bf16.msra.mxu3 %v1263_v3  ;;  %v1261_v11 = vld [vmem:[#allocation6 + $0xe8] sm:$0xff]  ;;  %v1236_v12 = vld [vmem:[#allocation6 + $0x20] sm:$0xff]  ;;  %v1235_v16 = vld [vmem:[#allocation6 + $0x18] sm:$0xff] }
  0x1c   :  { %563 = vmatpush.bf16.msra.mxu0 %v1238_v4  ;;  %v1244_v13 = vld [vmem:[#allocation6 + $0x60] sm:$0xff]  ;;  %v1243_v17 = vld [vmem:[#allocation6 + $0x58] sm:$0xff]  ;;  %v1234_v20 = vld [vmem:[#allocation6 + $0x10] sm:$0xff] }
  0x1d   :  { %577 = vmatpush.bf16.msra.mxu1 %v1246_v5  ;;  %v1252_v14 = vld [vmem:[#allocation6 + $0xa0] sm:$0xff]  ;;  %v1251_v18 = vld [vmem:[#allocation6 + $0x98] sm:$0xff]  ;;  %v1242_v21 = vld [vmem:[#allocation6 + $0x50] sm:$0xff] }
  0x1e   :  { %591 = vmatpush.bf16.msra.mxu2 %v1254_v6  ;;  %v1260_v15 = vld [vmem:[#allocation6 + $0xe0] sm:$0xff]  ;;  %v1259_v19 = vld [vmem:[#allocation6 + $0xd8] sm:$0xff]  ;;  %v1250_v22 = vld [vmem:[#allocation6 + $0x90] sm:$0xff] }
  0x1f   :  { %605 = vmatpush.bf16.msra.mxu3 %v1262_v7  ;;  %v1258_v23 = vld [vmem:[#allocation6 + $0xd0] sm:$0xff]  ;;  %v1233_v24 = vld [vmem:[#allocation6 + $0x8] sm:$0xff]  ;;  %v1232_v28 = vld [vmem:[#allocation6] sm:$0xff] }
  0x20   :  { %564 = vmatpush.bf16.msra.mxu0 %v1237_v8  ;;  %v1241_v25 = vld [vmem:[#allocation6 + $0x48] sm:$0xff]  ;;  %v1240_v29 = vld [vmem:[#allocation6 + $0x40] sm:$0xff]  ;;  %v1271_v34 = vld [vmem:[#allocation6 + $0x138] sm:$0xff]  ;;  %v113_v8 = vlaneseq }
  0x21   :  { %578 = vmatpush.bf16.msra.mxu1 %v1245_v9  ;;  %v1249_v26 = vld [vmem:[#allocation6 + $0x88] sm:$0xff]  ;;  %v1228_v31 = vld [vmem:[#allocation3 + $0x18] sm:$0xf0]  ;;  %v1279_v35 = vld [vmem:[#allocation6 + $0x178] sm:$0xff] }
  0x22   :  { %592 = vmatpush.bf16.msra.mxu2 %v1253_v10  ;;  %v1257_v27 = vld [vmem:[#allocation6 + $0xc8] sm:$0xff]  ;;  %v1248_v36 = vld [vmem:[#allocation6 + $0x80] sm:$0xff]  ;;  %v940_v38 = vld [vmem:[#allocation3 + $0x8] sm:$0xf]  ;;  %v114_v10 = vshrl.u32 %v113_v8, 7 }
  0x23   :  { %606 = vmatpush.bf16.msra.mxu3 %v1261_v11  ;;  %v932_v30 = vld [vmem:[#allocation3] sm:$0xf]  ;;  %v1225_v32 = vld [vmem:[#allocation3 + $0x4] sm:$0xf]  ;;  %v1256_v37 = vld [vmem:[#allocation6 + $0xc0] sm:$0xff] }
  0x24   :  { %565 = vmatpush.bf16.msra.mxu0 %v1236_v12  ;;  %v934_v33 = vld [vmem:[#allocation3 + $0x1c] sm:$0xf0]  ;;  %v1229_v39 = vld [vmem:[#allocation3 + $0x20] sm:$0xf0]  ;;  %v933_v40 = vor.u32 %v1228_v31, %v932_v30  ;;  %v1226_v41 = vld [vmem:[#allocation3 + $0xc] sm:$0xf] }
  0x25   :  { %579 = vmatpush.bf16.msra.mxu1 %v1244_v13  ;;  %v942_v42 = vld [vmem:[#allocation3 + $0x24] sm:$0xf0]  ;;  %v937_v43 = vor.u32 %v1225_v32, %v934_v33  ;;  %v1280_v44 = vld [vmem:[#allocation6 + $0x180] sm:$0xff]  ;;  %v941_v47 = vor.u32 %v1229_v39, %v940_v38  ;;  %v1269_v49 = vld [vmem:[#allocation6 + $0x128] sm:$0xff]  ;;  %v115_v12 = vadd.s32 8, %v114_v10  ;;  %v1531_v13 = vand.u32 127, %v113_v8 }
  0x26   :  { %593 = vmatpush.bf16.msra.mxu2 %v1252_v14  ;;  %v1270_v45 = vld [vmem:[#allocation6 + $0x130] sm:$0xff]  ;;  %v945_v48 = vor.u32 %v1226_v41, %v942_v42  ;;  %v1277_v50 = vld [vmem:[#allocation6 + $0x168] sm:$0xff]  ;;  %v1268_v51 = vld [vmem:[#allocation6 + $0x120] sm:$0xff] }
  0x27   :  { %607 = vmatpush.bf16.msra.mxu3 %v1260_v15  ;;  %v1278_v46 = vld [vmem:[#allocation6 + $0x170] sm:$0xff]  ;;  %v1276_v52 = vld [vmem:[#allocation6 + $0x160] sm:$0xff]  ;;  %v1267_v53 = vld [vmem:[#allocation6 + $0x118] sm:$0xff]  ;;  %v121_v15 = vmul.u32 2654435761, %v114_v10  ;;  %vm882_vm8 = vcmp.lt.s32.totalorder %v1531_v13, 10 }
  0x28   :  { %566 = vmatpush.bf16.msra.mxu0 %v1235_v16  ;;  %v1275_v54 = vld [vmem:[#allocation6 + $0x158] sm:$0xff]  ;;  %v956_v55 = vld [vmem:[#allocation3 + $0x18] sm:$0xf]  ;;  %v1266_v57 = vld [vmem:[#allocation6 + $0x110] sm:$0xff]  ;;  %v122_v16 = vmul.u32 2654435761, %v115_v12 }
  0x29   :  { %580 = vmatpush.bf16.msra.mxu1 %v1243_v17  ;;  %v1231_v56 = vld [vmem:[#allocation3 + $0x30] sm:$0xf0]  ;;  %v1274_v58 = vld [vmem:[#allocation6 + $0x150] sm:$0xff]  ;;  %v1265_v60 = vld [vmem:[#allocation6 + $0x108] sm:$0xff]  ;;  %v123_v17 = vmul.u32 668265263, %v1531_v13 }
  0x2a   :  { %594 = vmatpush.bf16.msra.mxu2 %v1251_v18  ;;  %v957_v59 = vor.u32 %v1231_v56, %v956_v55  ;;  %v1273_v61 = vld [vmem:[#allocation6 + $0x148] sm:$0xff]  ;;  %v1264_v62 = vld [vmem:[#allocation6 + $0x100] sm:$0xff]  ;;  %v948_v0 = vld [vmem:[#allocation3 + $0x10] sm:$0xf] }
  0x2b   :  { %608 = vmatpush.bf16.msra.mxu3 %v1259_v19  ;;  %v1272_v63 = vld [vmem:[#allocation6 + $0x140] sm:$0xff]  ;;  %v1230_v1 = vld [vmem:[#allocation3 + $0x28] sm:$0xf0]  ;;  %v1227_v2 = vld [vmem:[#allocation3 + $0x14] sm:$0xf]  ;;  %v124_v19 = vadd.s32 %v123_v17, %v121_v15 }
  0x2c   :  { %567 = vmatpush.bf16.msra.mxu0 %v1234_v20  ;;  %v950_v3 = vld [vmem:[#allocation3 + $0x2c] sm:$0xf0]  ;;  %v949_v4 = vor.u32 %v1230_v1, %v948_v0  ;;  %v1288_v6 = vld [vmem:[#allocation8 + $0x38] sm:$0xff]  ;;  %v1286_v9 = vld [vmem:[#allocation8 + $0x28] sm:$0xff]  ;;  %v125_v20 = vadd.s32 %v123_v17, %v122_v16 }
  0x2d   :  { %581 = vmatpush.bf16.msra.mxu1 %v1242_v21  ;;  %v953_v5 = vor.u32 %v1227_v2, %v950_v3  ;;  %v1287_v7 = vld [vmem:[#allocation8 + $0x30] sm:$0xff]  ;;  %v1285_v11 = vld [vmem:[#allocation8 + $0x20] sm:$0xff]  ;;  %v1284_v14 = vld [vmem:[#allocation8 + $0x18] sm:$0xff] }
  0x2e   :  { %595 = vmatpush.bf16.msra.mxu2 %v1250_v22  ;;  %v1283_v18 = vld [vmem:[#allocation8 + $0x10] sm:$0xff]  ;;  %v1282_v21 = vld [vmem:[#allocation8 + $0x8] sm:$0xff]  ;;  %v127_v22 = vstv %s126_s23  ;;  %v1296_v33 = vld [vmem:[#allocation9 + $0x38] sm:$0xff] }
  0x2f   :  { %609 = vmatpush.bf16.msra.mxu3 %v1258_v23  ;;  %v1291_v15 = vld [vmem:[#allocation9 + $0x10] sm:$0xff]  ;;  %v1290_v16 = vld [vmem:[#allocation9 + $0x8] sm:$0xff]  ;;  %v1289_v17 = vld [vmem:[#allocation9] sm:$0xff] }
  0x30   :  { %568 = vmatpush.bf16.msra.mxu0 %v1233_v24  ;;  %v1537_v24 = vadd.s32 %v127_v22, %v124_v19 }
  0x31   :  { %582 = vmatpush.bf16.msra.mxu1 %v1241_v25  ;;  %v1539_v25 = vadd.s32 %v127_v22, %v125_v20 }
  0x32   :  { %596 = vmatpush.bf16.msra.mxu2 %v1249_v26  ;;  %v1541_v26 = vld [vmem:[#allocation11] sm:$0xff]  ;;  %v662_v31 = vadd.s32 2146121005, %v1537_v24 }
  0x33   :  { %610 = vmatpush.bf16.msra.mxu3 %v1257_v27  ;;  %v228_v30 = vperm.slane %v1541_v26, 0  ;;  %v663_v32 = vadd.s32 2146121005, %v1539_v25  ;;  %v763_v19 = vadd.s32 4292242010, %v1539_v25 }
  0x34   :  { %569 = vmatpush.bf16.msra.mxu0 %v1232_v28 }
  0x35   :  { %583 = vmatpush.bf16.msra.mxu1 %v1240_v29  ;;  %v1281_v29 = vld [vmem:[#allocation8] sm:$0xff] }
  0x36   :  { %597 = vmatpush.bf16.msra.mxu2 %v1248_v36  ;;  %v665_v36 = vshll.u32 %v663_v32, 13 }
  0x37   :  { %611 = vmatpush.bf16.msra.mxu3 %v1256_v37  ;;  %570 = vmatmul.bf16.vlgmr.msra.gmra.mxu0 %v933_v40  ;;  %v1295_v37 = vld [vmem:[#allocation9 + $0x30] sm:$0xff] }
  0x38   :  { %618 = vmatpush.bf16.msrb.mxu0 %v1271_v34  ;;  %584 = vmatmul.bf16.vlgmr.msra.gmra.mxu1 %v937_v43  ;;  %v667_v43 = vxor.u32 %v665_v36, %v663_v32 }
  0x39   :  { %632 = vmatpush.bf16.msrb.mxu1 %v1279_v35  ;;  %598 = vmatmul.bf16.vlgmr.msra.gmra.mxu2 %v941_v47  ;;  %v664_v35 = vshll.u32 %v662_v31, 13 }
  0x3a   :  { %653 = vmatpush.bf16.msrb.mxu2 %v1280_v44  ;;  %612 = vmatmul.bf16.vlgmr.msra.gmra.mxu3 %v945_v48  ;;  %v1294_v44 = vld [vmem:[#allocation9 + $0x28] sm:$0xff] }
  0x3b   :  { %746 = vmatpush.bf16.msrb.mxu3 %v1288_v6  ;;  %v666_v42 = vxor.u32 %v664_v35, %v662_v31 }
  0x3c   :  { %619 = vmatpush.bf16.msrb.mxu0 %v1270_v45 }
  0x3d   :  { %633 = vmatpush.bf16.msrb.mxu1 %v1278_v46  ;;  %v668_v48 = vmul.u32 3266489909, %v666_v42 }
  0x3e   :  { %846 = vmatpush.bf16.msra.mxu2 %v1296_v33 }
  0x3f   :  { %747 = vmatpush.bf16.msrb.mxu3 %v1287_v7  ;;  %v670_v55 = vshll.u32 %v668_v48, 17 }
  0x40   :  { %620 = vmatpush.bf16.msrb.mxu0 %v1269_v49  ;;  %v669_v49 = vmul.u32 3266489909, %v667_v43  ;;  %v862_v43 = vadd.s32 2143395719, %v1537_v24 }
  0x41   :  { %634 = vmatpush.bf16.msrb.mxu1 %v1277_v50  ;;  %v1293_v50 = vld [vmem:[#allocation9 + $0x20] sm:$0xff] }
  0x42   :  { %847 = vmatpush.bf16.msra.mxu2 %v1295_v37  ;;  %v671_v56 = vshll.u32 %v669_v49, 17 }
  0x43   :  { %748 = vmatpush.bf16.msrb.mxu3 %v1286_v9 }
  0x44   :  { %621 = vmatpush.bf16.msrb.mxu0 %v1268_v51 }
  0x45   :  { %635 = vmatpush.bf16.msrb.mxu1 %v1276_v52 }
  0x46   :  { %848 = vmatpush.bf16.msra.mxu2 %v1294_v44  ;;  %v864_v44 = vshll.u32 %v862_v43, 13 }
  0x47   :  { %749 = vmatpush.bf16.msrb.mxu3 %v1285_v11 }
  0x48   :  { %622 = vmatpush.bf16.msrb.mxu0 %v1267_v53 }
  0x49   :  { %636 = vmatpush.bf16.msrb.mxu1 %v1275_v54  ;;  %1154 = vmatmul.msk.bf16.vlgmr.msrb.gmra.mxu2 %vm558_vm0, %v957_v59 }
  0x4a   :  { %849 = vmatpush.bf16.msra.mxu2 %v1293_v50 }
  0x4b   :  { %750 = vmatpush.bf16.msrb.mxu3 %v1284_v14  ;;  %v1292_v14 = vld [vmem:[#allocation9 + $0x18] sm:$0xff] }
  0x4c   :  { %623 = vmatpush.bf16.msrb.mxu0 %v1266_v57 }
  0x4d   :  { %637 = vmatpush.bf16.msrb.mxu1 %v1274_v58 }
  0x4e   :  { %850 = vmatpush.bf16.msra.mxu2 %v1292_v14 }
  0x4f   :  { %751 = vmatpush.bf16.msrb.mxu3 %v1283_v18  ;;  %v762_v18 = vadd.s32 4292242010, %v1537_v24 }
  0x50   :  { %624 = vmatpush.bf16.msrb.mxu0 %v1265_v60 }
  0x51   :  { %638 = vmatpush.bf16.msrb.mxu1 %v1273_v61  ;;  %v672_v61 = vxor.u32 %v670_v55, %v668_v48  ;;  %v764_v20 = vshll.u32 %v762_v18, 13 }
  0x52   :  { %851 = vmatpush.bf16.msra.mxu2 %v1291_v15 }
  0x53   :  { %752 = vmatpush.bf16.msrb.mxu3 %v1282_v21  ;;  %v674_v3 = vmul.u32 3432918353, %v672_v61  ;;  %v765_v21 = vshll.u32 %v763_v19, 13  ;;  %v766_v22 = vxor.u32 %v764_v20, %v762_v18 }
  0x54   :  { %625 = vmatpush.bf16.msrb.mxu0 %v1264_v62  ;;  %v673_v62 = vxor.u32 %v671_v56, %v669_v49 }
  0x55   :  { %639 = vmatpush.bf16.msrb.mxu1 %v1272_v63  ;;  %vm676_vm1 = vcmp.lt.s32.totalorder %v674_v3, 429496730 }
  0x56   :  { %852 = vmatpush.bf16.msra.mxu2 %v1290_v16 }
  0x57   :  { %626 = vmatmul.bf16.vlgmr.msrb.gmra.mxu0 %v949_v4  ;;  %753 = vmatpush.bf16.msrb.mxu3 %v1281_v29  ;;  %v675_v4 = vmul.u32 3432918353, %v673_v62 }
  0x58   :  { %640 = vmatmul.bf16.vlgmr.msrb.gmra.mxu1 %v953_v5 }
  0x59   :  { %vm677_vm2 = vcmp.lt.s32.totalorder %v675_v4, 429496730 }
  0x5a   :  { %vm1187_vm3 = vmpackc.low %vm677_vm2, %vm676_vm1  ;;  %853 = vmatpush.bf16.msra.mxu2 %v1289_v17 }
  0xb4   :  { %v571_v23 = vpop.f32.mrf.mxu0 }
  0xb5   :  { %v585_v27 = vpop.f32.mrf.mxu1  ;;  %v572_v34 = vadd.f32 %v571_v23, %v228_v30  ;;  %v767_v23 = vxor.u32 %v765_v21, %v763_v19 }
  0xb7   :  { %v586_v41 = vadd.f32 %v585_v27, %v572_v34  ;;  %v768_v27 = vmul.u32 3266489909, %v766_v22  ;;  %v697_v34 = vperm.slane %v1541_v26, 1 }
  0xb9   :  { %v770_v29 = vshll.u32 %v768_v27, 17 }
  0xbb   :  { %v772_v32 = vxor.u32 %v770_v29, %v768_v27 }
  0xbc   :  { %v599_v28 = vpop.f32.mrf.mxu2  ;;  %v573_v38 = vpop.f32.mrf.mxu0 }
  0xbd   :  { %v587_v39 = vpop.f32.mrf.mxu1  ;;  %v613_v45 = vpop.f32.mrf.mxu3  ;;  %v574_v46 = vadd.f32 %v573_v38, %v228_v30  ;;  %v600_v47 = vadd.f32 %v599_v28, %v586_v41  ;;  %v769_v28 = vmul.u32 3266489909, %v767_v23  ;;  %v774_v35 = vmul.u32 3432918353, %v772_v32 }
  0xbf   :  { %v588_v51 = vadd.f32 %v587_v39, %v574_v46  ;;  %v614_v54 = vadd.f32 %v613_v45, %v600_v47  ;;  %v771_v30 = vshll.u32 %v769_v28, 17  ;;  %vm776_vm4 = vcmp.lt.s32.totalorder %v774_v35, 429496730 }
  0xc0   :  { %v866_v45 = vxor.u32 %v864_v44, %v862_v43  ;;  %v863_v46 = vadd.s32 2143395719, %v1539_v25 }
  0xc1   :  { %v773_v33 = vxor.u32 %v771_v30, %v769_v28 }
  0xc2   :  { %v868_v47 = vmul.u32 3266489909, %v866_v45  ;;  %v865_v48 = vshll.u32 %v863_v46, 13 }
  0xc3   :  { %v775_v36 = vmul.u32 3432918353, %v773_v33 }
  0xc4   :  { %v601_v40 = vpop.f32.mrf.mxu2  ;;  %v870_v49 = vshll.u32 %v868_v47, 17  ;;  %v867_v50 = vxor.u32 %v865_v48, %v863_v46 }
  0xc5   :  { %v602_v58 = vadd.f32 %v601_v40, %v588_v51  ;;  %v615_v60 = vpop.f32.mrf.mxu3  ;;  %vm777_vm5 = vcmp.lt.s32.totalorder %v775_v36, 429496730 }
  0xc6   :  { %vm1222_vm6 = vmpackc.low %vm777_vm5, %vm776_vm4  ;;  %v872_v51 = vxor.u32 %v870_v49, %v868_v47 }
  0xc7   :  { %v616_v63 = vadd.f32 %v615_v60, %v602_v58 }
  0xc8   :  { %v874_v55 = vmul.u32 3432918353, %v872_v51 }
  0xca   :  { %vm876_vm7 = vcmp.lt.s32.totalorder %v874_v55, 429496730 }
  0xcc   :  { %v655_v57 = vpop.f32.mrf.mxu2 }
  0xd4   :  { %v627_v52 = vpop.f32.mrf.mxu0  ;;  %v657_v8 = vpop.f32.mrf.mxu2 }
  0xd5   :  { %v641_v53 = vpop.f32.mrf.mxu1  ;;  %v628_v59 = vadd.f32 %v627_v52, %v614_v54  ;;  %v869_v52 = vmul.u32 3266489909, %v867_v50 }
  0xd7   :  { %v642_v0 = vadd.f32 %v641_v53, %v628_v59  ;;  %v797_v53 = vperm.slane %v1541_v26, 2  ;;  %v871_v56 = vshll.u32 %v869_v52, 17 }
  0xd9   :  { %v656_v6 = vadd.f32 %v655_v57, %v642_v0  ;;  %v873_v59 = vxor.u32 %v871_v56, %v869_v52 }
  0xdb   :  { %v660_v10 = vmax.f32 %v656_v6, 0.0  ;;  %v875_v62 = vmul.u32 3432918353, %v873_v59 }
  0xdc   :  { %v629_v1 = vpop.f32.mrf.mxu0 }
  0xdd   :  { %v630_v2 = vadd.f32 %v629_v1, %v616_v63  ;;  %v643_v5 = vpop.f32.mrf.mxu1  ;;  %vm877_vm9 = vcmp.lt.s32.totalorder %v875_v62, 429496730 }
  0xdf   :  { %v644_v7 = vadd.f32 %v643_v5, %v630_v2 }
  0xe1   :  { %v658_v9 = vadd.f32 %v657_v8, %v644_v7 }
  0xe3   :  { %v661_v11 = vmax.f32 %v658_v9, 0.0 }
  0xe5   :  { %v1188_v12 = vpack.c.bf16 %v661_v11, %v660_v10 }
  0xe7   :  { %1189 = vmatmul.msk.bf16.vlgmr.msrb.gmra.mxu3 %vm1187_vm3, %v1188_v12 }
 0x16a   :  { %v755_v31 = vpop.f32.mrf.mxu3 }
 0x16b   :  { %v756_v37 = vadd.f32 %v755_v31, %v697_v34 }
 0x16d   :  { %v760_v40 = vmax.f32 %v756_v37, 0.0 }
 0x172   :  { %v757_v38 = vpop.f32.mrf.mxu3 }
 0x173   :  { %v758_v39 = vadd.f32 %v757_v38, %v697_v34 }
 0x175   :  { %v761_v41 = vmax.f32 %v758_v39, 0.0 }
 0x177   :  { %v1223_v42 = vpack.c.bf16 %v761_v41, %v760_v40 }
 0x179   :  { %1224 = vmatmul.msk.bf16.vlgmr.msra.gmra.mxu2 %vm1222_vm6, %v1223_v42 }
 0x1fc   :  { %v855_v54 = vpop.f32.mrf.mxu2 }
 0x1fd   :  { %v856_v57 = vadd.f32 %v855_v54, %v797_v53 }
 0x1ff   :  { %v860_v58 = vmax.f32 %v856_v57, 0.0 }
 0x201   :  { %v878_v24 = vmul.f32 1.6666666, %v860_v58 }
 0x203   :  { %v880_v60 = vsel %vm876_vm7, %v878_v24, 0.0 }
 0x204   :  { %v857_v25 = vpop.f32.mrf.mxu2  ;;  %v883_v61 = vsel %vm882_vm8, %v880_v60, -1e+30 }
 0x205   :  { %v858_v63 = vadd.f32 %v857_v25, %v797_v53  ;;  %885 = vmax.xlane.f32.xlu0 %v883_v61 }
 0x207   :  { %v861_v0 = vmax.f32 %v858_v63, 0.0 }
 0x209   :  { %v879_v1 = vmul.f32 1.6666666, %v861_v0 }
 0x20b   :  { %v881_v26 = vsel %vm877_vm9, %v879_v1, 0.0 }
 0x20c   :  { %v884_v2 = vsel %vm882_vm8, %v881_v26, -1e+30 }
 0x20d   :  { %887 = vmax.xlane.f32.xlu0 %v884_v2 }
 0x278   :  { %v886_v3 = vpop.xlane.xlu0 %885 }
 0x279   :  { %v889_v4 = vsub.f32 %v883_v61, %v886_v3 }
 0x27b   :  { %v891_v5 = vmul.f32 1.442695, %v889_v4 }
 0x27d   :  { %1309 = vpow2.f32 %v891_v5 }
 0x280   :  { %v888_v6 = vpop.xlane.xlu0 %887 }
 0x281   :  { %v890_v7 = vsub.f32 %v884_v2, %v888_v6 }
 0x283   :  { %v1310_v8 = vpop.eup %1309  ;;  %v893_v13 = vmul.f32 1.442695, %v890_v7 }
 0x284   :  { %895 = vadd.xlane.f32.xlu1 %v1310_v8 }
 0x285   :  { %1311 = vpow2.f32 %v893_v13 }
 0x28b   :  { %v1312_v9 = vpop.eup %1311 }
 0x28c   :  { %897 = vadd.xlane.f32.xlu1 %v1312_v9 }
 0x2f7   :  { %v896_v10 = vpop.xlane.xlu1 %895 }
 0x2f8   :  { %1313 = vlog2.f32 %v896_v10 }
 0x2fe   :  { %v1314_v11 = vpop.eup %1313 }
 0x2ff   :  { %v900_v12 = vmul.f32 0.6931472, %v1314_v11  ;;  %v898_v14 = vpop.xlane.xlu1 %897 }
 0x300   :  { %1315 = vlog2.f32 %v898_v14 }
 0x301   :  { %v903_v15 = vadd.f32 %v900_v12, %v886_v3 }
 0x303   :  { %v905_v16 = vsub.f32 %v883_v61, %v903_v15 }
 0x305   :  { %907 = vst [vmem:[#allocation12] sm:$0xff] %v905_v16 }
 0x306   :  { %v1316_v17 = vpop.eup %1315 }
 0x307   :  { %v902_v18 = vmul.f32 0.6931472, %v1316_v17 }
 0x309   :  { %v904_v19 = vadd.f32 %v902_v18, %v888_v6 }
 0x30b   :  { %v906_v20 = vsub.f32 %v884_v2, %v904_v19 }
 0x30d   :  { %908 = vst [vmem:[#allocation12 + $0x8] sm:$0xff] %v906_v20 }
 0x30e   :  { %921 = dma.vmem_to_hbm [thread:$0]  %s914_s24, 256, %s916_s27, [#allocation5], %s1479_s28, %s1479_s28, %s1480_s29  }
 0x30f   :  { %1467 = dma.done.wait [#allocation5], 256  }
 0x310   :  { %1468 = vsyncadd [#allocation5], 4294967040 }
 0x311   :  { %926 = vsyncpa [#allocation4], 1 }
 0x312   :  { %927 = vsyncpa [#allocation7], 1 }
 0x313   :  { %928 = vsyncpa [#allocation10], 1 }
 0x314   :  { %929 = vsyncpa [#allocation5], 1 }

</bundles_post_ra>
